<compile_context>
chip_gen: v6e
topology: v6e:2x2x1
jax: 0.10.0
libtpu: 0.0.40
codegen_flags: <defaults>
</compile_context>

<pallas_src>
import functools

import jax
import jax.numpy as jnp
from jax.experimental import pallas as pl
from jax.experimental.pallas import tpu as pltpu

_LANE = 128


def _round_up(n, m):
    return ((n + m - 1) // m) * m


def _pick_tile(total, target, align):
    """Largest divisor of `total` that is <= target and a multiple of `align`.
    Falls back to the full extent (always a legal block size)."""
    if total <= target:
        return total
    for t in range(target, 0, -1):
        if total % t == 0 and t % align == 0:
            return t
    return total


def _blk_vmem_bytes(shape, itemsize):
    """Padded VMEM footprint of one buffer: second-minor -> 8, minor -> 128."""
    shape = tuple(shape)
    if len(shape) == 1:
        shape = (1,) + shape
    lead = 1
    for s in shape[:-2]:
        lead *= s
    return lead * _round_up(shape[-2], 8) * _round_up(shape[-1], _LANE) * itemsize


def _vmem_budget_bytes():
    """~75% of physical VMEM (≈48 MiB on v7x, ≈96 MiB on v5e/v6e)."""
    try:
        cap = int(pltpu.get_tpu_info().vmem_capacity_bytes)
    except Exception:
        cap = 64 * 1024 * 1024          # conservative (v7x-sized) fallback
    return (3 * cap) // 4


def _dynamic_linear_kernel(mu_ref, c_ref, d_ref, x_ref, o_ref,
                           p_scr, w_scr, b_scr, *, in_dim, out_dim, odp, op_dtype):
    """One grid step = (batch tile, seq tile).

    mu_ref : (TB, mu_dim)          conditioning features for this batch tile
    c_ref  : (mu_dim, rows*odp)    composed decoder weight W_dec^T·V (resident)
    d_ref  : (1, rows*odp)         composed decoder bias  b_dec·V   (resident)
    x_ref  : (TB, TS, in_dim)      input tile
    o_ref  : (TB, TS, out_dim)     output tile
    p_scr  : (TB, rows*odp)  VMEM  generated params, row-major, lane-padded rows
    w_scr  : (TB, in_dim, out_dim) VMEM  per-sample weight
    b_scr  : (TB, 1, out_dim)      VMEM  per-sample bias
    """
    # Generate this batch tile's weight/bias once; reuse across all seq tiles.
    # Requires the seq axis (grid axis 1) to be innermost and "arbitrary".
    @pl.when(pl.program_id(1) == 0)
    def _():
        # Single MXU matmul (tb, mu_dim) @ (mu_dim, rows*odp); one dense store.
        p_scr[...] = jnp.dot(mu_ref[...], c_ref[...],
                             preferred_element_type=jnp.float32) + d_ref[...]
        # Split the flat params into the 3-D weight + bias scratches.  Each slice
        # starts at a 128-lane-aligned offset (odp is a multiple of 128); these
        # are plain vreg copies, once per batch tile.
        for r in range(in_dim):
            w_scr[:, r:r + 1, :] = p_scr[:, r * odp:r * odp + out_dim][:, None, :]
        b_scr[...] = p_scr[:, in_dim * odp:in_dim * odp + out_dim][:, None, :]

    # Batched dynamic linear: y[b] = x[b] @ weight[b] + bias[b].
    # Operands stay in the input dtype (bf16 callers are not upcast); f32 accum.
    w = w_scr[...].astype(op_dtype)
    y = jnp.einsum('bsd,bde->bse', x_ref[...], w,
                   preferred_element_type=jnp.float32)
    o_ref[...] = (y + b_scr[...]).astype(o_ref.dtype)


def dynamic_linear(x, mu, w_dec, b_dec, v, *, in_dim, out_dim, k,
                   batch_tile=8, seq_tile=1024):
    """x: (B,S,in_dim), mu: (B,mu_dim), w_dec: ((in_dim+1)*k, mu_dim),
       b_dec: ((in_dim+1)*k,), v: (k, out_dim)."""
    B, S, xd = x.shape
    assert xd == in_dim
    mu_dim = mu.shape[-1]
    rows = in_dim + 1
    assert w_dec.shape == (rows * k, mu_dim)
    assert v.shape == (k, out_dim)
    f32 = jnp.float32

    # --- One-time parameter composition (trace-time, parameter-only work) ---
    #   param(mu) = (mu @ W_dec^T + b_dec).reshape(rows,k) @ V == mu @ C + D
    # Each row's out_dim columns are zero-padded to odp (multiple of 128) so the
    # in-kernel per-row slices are lane-aligned; the padding never reaches HBM
    # output (the kernel only reads the first out_dim lanes of each row).
    odp = _round_up(out_dim, _LANE)
    n_cols = rows * odp
    v32 = v.astype(f32)
    w3 = w_dec.astype(f32).reshape(rows, k, mu_dim)
    c = jnp.einsum('rkm,ke->mre', w3, v32)                       # (mu_dim, rows, out)
    c = jnp.pad(c, ((0, 0), (0, 0), (0, odp - out_dim))).reshape(mu_dim, n_cols)
    d = jnp.einsum('rk,ke->re', b_dec.astype(f32).reshape(rows, k), v32)
    d = jnp.pad(d, ((0, 0), (0, odp - out_dim))).reshape(1, n_cols)

    # --- Tile selection (lane/sublane-padding-aware VMEM accounting) --------
    # tb is a multiple of 8 or the full batch (mu block second-minor constraint).
    # For v7x megacore, B >= 2*tb keeps both TensorCores busy on grid axis 0.
    tb = _pick_tile(B, batch_tile, 8)
    itemsize = jnp.dtype(x.dtype).itemsize
    budget = _vmem_budget_bytes()

    def vmem_estimate(ts):
        return (2 * _blk_vmem_bytes((tb, ts, in_dim), itemsize)      # x   (2 bufs)
                + 2 * _blk_vmem_bytes((tb, ts, out_dim), itemsize)   # out (2 bufs)
                + 2 * _blk_vmem_bytes((tb, mu_dim), 4)               # mu
                + 2 * _blk_vmem_bytes((mu_dim, n_cols), 4)           # C resident
                + 2 * _blk_vmem_bytes((1, n_cols), 4)                # D resident
                + _blk_vmem_bytes((tb, n_cols), 4)                   # p_scr
                + _blk_vmem_bytes((tb, in_dim, out_dim), 4)          # w_scr
                + _blk_vmem_bytes((tb, 1, out_dim), 4))              # b_scr

    target = seq_tile
    ts = _pick_tile(S, target, 8)
    while vmem_estimate(ts) > budget and target > 8:
        target = max(8, target // 2)
        new_ts = _pick_tile(S, target, 8)
        if new_ts >= ts:        # could not find a smaller legal tile
            break
        ts = new_ts
    if vmem_estimate(ts) > budget:
        raise ValueError(
            f"DynamicLinear tiling does not fit VMEM: seq tile {ts} needs "
            f"~{vmem_estimate(ts)} bytes, budget {budget} bytes.")

    grid = (B // tb, S // ts)

    kernel = functools.partial(_dynamic_linear_kernel, in_dim=in_dim,
                               out_dim=out_dim, odp=odp, op_dtype=x.dtype)

    return pl.pallas_call(
        kernel,
        out_shape=jax.ShapeDtypeStruct((B, S, out_dim), x.dtype),
        grid_spec=pltpu.PrefetchScalarGridSpec(
            num_scalar_prefetch=0,
            grid=grid,
            in_specs=[
                pl.BlockSpec((tb, mu_dim), lambda bi, si: (bi, 0)),
                pl.BlockSpec((mu_dim, n_cols), lambda bi, si: (0, 0)),   # resident C
                pl.BlockSpec((1, n_cols), lambda bi, si: (0, 0)),        # resident D
                pl.BlockSpec((tb, ts, in_dim), lambda bi, si: (bi, si, 0)),
            ],
            out_specs=pl.BlockSpec((tb, ts, out_dim), lambda bi, si: (bi, si, 0)),
            scratch_shapes=[
                pltpu.VMEM((tb, n_cols), jnp.float32),
                pltpu.VMEM((tb, in_dim, out_dim), jnp.float32),
                pltpu.VMEM((tb, 1, out_dim), jnp.float32),
            ],
        ),
        compiler_params=pltpu.CompilerParams(
            # Batch tiles shard across TensorCores; seq axis must stay innermost
            # and "arbitrary" for the per-batch-tile scratch reuse to be valid.
            dimension_semantics=("parallel", "arbitrary"),
            vmem_limit_bytes=budget,
        ),
    )(mu.astype(f32), c, d, x)


def reference(x, mu, w_dec, b_dec, v, *, in_dim, out_dim, k):
    B = mu.shape[0]
    u = (mu @ w_dec.T + b_dec).reshape(B, in_dim + 1, k)
    param = jnp.einsum("bik,kj->bij", u, v)
    weight = param[:, :-1, :]
    bias = param[:, -1, :]
    return jnp.einsum("bsd,bde->bse", x, weight) + bias[:, None, :]


if __name__ == "__main__":
    B, S = 2, 8
    in_dim, out_dim, mu_dim, k = 16, 32, 24, 30
    N = (in_dim + 1) * k

    key = jax.random.PRNGKey(0)
    kx, kmu, kw, kb, kv = jax.random.split(key, 5)

    x = jax.random.normal(kx, (B, S, in_dim), dtype=jnp.float32)
    mu = jax.random.normal(kmu, (B, mu_dim), dtype=jnp.float32)

    # Deterministic synthetic parameters (module shapes from __init__).
    # NOTE: PyTorch initializes V to zeros (output would be identically zero);
    # small random values are used so the kernel exercises real compute.
    w_dec = 0.1 * jax.random.normal(kw, (N, mu_dim), dtype=jnp.float32)
    b_dec = 0.1 * jax.random.normal(kb, (N,), dtype=jnp.float32)
    v = 0.1 * jax.random.normal(kv, (k, out_dim), dtype=jnp.float32)

    out = dynamic_linear(x, mu, w_dec, b_dec, v, in_dim=in_dim, out_dim=out_dim, k=k)
    out = jax.block_until_ready(out)

    ref = reference(x, mu, w_dec, b_dec, v, in_dim=in_dim, out_dim=out_dim, k=k)
    assert out.shape == (B, S, out_dim)
    assert jnp.allclose(out, ref, rtol=1e-3, atol=1e-3), "mismatch vs reference"

    print("KERNEL_OK")
</pallas_src>

<mosaic_0001>
module attributes {stable_mosaic.version = 11 : i64} {
  func.func @_dynamic_linear_kernel(%arg0: i32, %arg1: i32, %arg2: memref<2x24xf32, #tpu.memory_space<vmem>>, %arg3: memref<24x2176xf32, #tpu.memory_space<vmem>>, %arg4: memref<1x2176xf32, #tpu.memory_space<vmem>>, %arg5: memref<2x8x16xf32, #tpu.memory_space<vmem>>, %arg6: memref<2x8x32xf32, #tpu.memory_space<vmem>>, %arg7: memref<2x2176xf32, #tpu.memory_space<vmem>>, %arg8: memref<2x16x32xf32, #tpu.memory_space<vmem>>, %arg9: memref<2x1x32xf32, #tpu.memory_space<vmem>>) attributes {dimension_semantics = [#tpu.dimension_semantics<parallel>, #tpu.dimension_semantics<arbitrary>], iteration_bounds = array<i64: 1, 1>, scalar_prefetch = 0 : i64, scratch_operands = 3 : i64, tpu.core_type = #tpu.core_type<tc>, window_params = [{transform_indices = @transform_0, window_bounds = array<i64: 2, 24>}, {pipeline_mode = #tpu.pipeline_mode<synchronous>, transform_indices = @transform_1, window_bounds = array<i64: 24, 2176>}, {pipeline_mode = #tpu.pipeline_mode<synchronous>, transform_indices = @transform_2, window_bounds = array<i64: 1, 2176>}, {transform_indices = @transform_3, window_bounds = array<i64: 2, 8, 16>}, {transform_indices = @transform_4, window_bounds = array<i64: 2, 8, 32>}]} {
    %c0_i32 = arith.constant 0 : i32
    %0 = arith.cmpi eq, %arg1, %c0_i32 : i32
    %1 = arith.extui %0 : i1 to i32
    %c0_i32_0 = arith.constant 0 : i32
    %2 = arith.cmpi ne, %1, %c0_i32_0 : i32
    scf.if %2 {
      %c0_12 = arith.constant 0 : index
      %c0_13 = arith.constant 0 : index
      %10 = vector.load %arg2[%c0_12, %c0_13] : memref<2x24xf32, #tpu.memory_space<vmem>>, vector<2x24xf32>
      %c0_14 = arith.constant 0 : index
      %c0_15 = arith.constant 0 : index
      %11 = vector.load %arg3[%c0_14, %c0_15] : memref<24x2176xf32, #tpu.memory_space<vmem>>, vector<24x2176xf32>
      %cst_16 = arith.constant dense<0.000000e+00> : vector<2x2176xf32>
      %12 = tpu.matmul %10, %11, %cst_16 {dimension_numbers = #tpu.dot_dimension_numbers<[1], [0], [0], [1], [0, 0, 1, 1], [], []>} : vector<2x24xf32>, vector<24x2176xf32>, vector<2x2176xf32> -> vector<2x2176xf32>
      %c0_17 = arith.constant 0 : index
      %c0_18 = arith.constant 0 : index
      %13 = vector.load %arg4[%c0_17, %c0_18] : memref<1x2176xf32, #tpu.memory_space<vmem>>, vector<1x2176xf32>
      %14 = vector.broadcast %13 : vector<1x2176xf32> to vector<2x2176xf32>
      %15 = arith.addf %12, %14 : vector<2x2176xf32>
      %c0_19 = arith.constant 0 : index
      %c0_20 = arith.constant 0 : index
      %16 = vector.load %arg7[%c0_19, %c0_20] : memref<2x2176xf32, #tpu.memory_space<vmem>>, vector<2x2176xf32>
      tpu.vector_store %arg7[%c0_19, %c0_20], %15 {strides = array<i32>} : memref<2x2176xf32, #tpu.memory_space<vmem>>, vector<2x2176xf32>,
      %c0_21 = arith.constant 0 : index
      %c0_22 = arith.constant 0 : index
      %17 = vector.load %arg7[%c0_21, %c0_22] : memref<2x2176xf32, #tpu.memory_space<vmem>>, vector<2x32xf32>
      %18 = vector.shape_cast %17 : vector<2x32xf32> to vector<2x1x32xf32>
      %c0_23 = arith.constant 0 : index
      %c0_24 = arith.constant 0 : index
      %c0_25 = arith.constant 0 : index
      %19 = vector.load %arg8[%c0_23, %c0_24, %c0_25] : memref<2x16x32xf32, #tpu.memory_space<vmem>>, vector<2x1x32xf32>
      tpu.vector_store %arg8[%c0_23, %c0_24, %c0_25], %18 {strides = array<i32>} : memref<2x16x32xf32, #tpu.memory_space<vmem>>, vector<2x1x32xf32>,
      %c0_26 = arith.constant 0 : index
      %c128 = arith.constant 128 : index
      %20 = vector.load %arg7[%c0_26, %c128] : memref<2x2176xf32, #tpu.memory_space<vmem>>, vector<2x32xf32>
      %21 = vector.shape_cast %20 : vector<2x32xf32> to vector<2x1x32xf32>
      %c0_27 = arith.constant 0 : index
      %c1 = arith.constant 1 : index
      %c0_28 = arith.constant 0 : index
      %22 = vector.load %arg8[%c0_27, %c1, %c0_28] : memref<2x16x32xf32, #tpu.memory_space<vmem>>, vector<2x1x32xf32>
      tpu.vector_store %arg8[%c0_27, %c1, %c0_28], %21 {strides = array<i32>} : memref<2x16x32xf32, #tpu.memory_space<vmem>>, vector<2x1x32xf32>,
      %c0_29 = arith.constant 0 : index
      %c256 = arith.constant 256 : index
      %23 = vector.load %arg7[%c0_29, %c256] : memref<2x2176xf32, #tpu.memory_space<vmem>>, vector<2x32xf32>
      %24 = vector.shape_cast %23 : vector<2x32xf32> to vector<2x1x32xf32>
      %c0_30 = arith.constant 0 : index
      %c2 = arith.constant 2 : index
      %c0_31 = arith.constant 0 : index
      %25 = vector.load %arg8[%c0_30, %c2, %c0_31] : memref<2x16x32xf32, #tpu.memory_space<vmem>>, vector<2x1x32xf32>
      tpu.vector_store %arg8[%c0_30, %c2, %c0_31], %24 {strides = array<i32>} : memref<2x16x32xf32, #tpu.memory_space<vmem>>, vector<2x1x32xf32>,
      %c0_32 = arith.constant 0 : index
      %c384 = arith.constant 384 : index
      %26 = vector.load %arg7[%c0_32, %c384] : memref<2x2176xf32, #tpu.memory_space<vmem>>, vector<2x32xf32>
      %27 = vector.shape_cast %26 : vector<2x32xf32> to vector<2x1x32xf32>
      %c0_33 = arith.constant 0 : index
      %c3 = arith.constant 3 : index
      %c0_34 = arith.constant 0 : index
      %28 = vector.load %arg8[%c0_33, %c3, %c0_34] : memref<2x16x32xf32, #tpu.memory_space<vmem>>, vector<2x1x32xf32>
      tpu.vector_store %arg8[%c0_33, %c3, %c0_34], %27 {strides = array<i32>} : memref<2x16x32xf32, #tpu.memory_space<vmem>>, vector<2x1x32xf32>,
      %c0_35 = arith.constant 0 : index
      %c512 = arith.constant 512 : index
      %29 = vector.load %arg7[%c0_35, %c512] : memref<2x2176xf32, #tpu.memory_space<vmem>>, vector<2x32xf32>
      %30 = vector.shape_cast %29 : vector<2x32xf32> to vector<2x1x32xf32>
      %c0_36 = arith.constant 0 : index
      %c4 = arith.constant 4 : index
      %c0_37 = arith.constant 0 : index
      %31 = vector.load %arg8[%c0_36, %c4, %c0_37] : memref<2x16x32xf32, #tpu.memory_space<vmem>>, vector<2x1x32xf32>
      tpu.vector_store %arg8[%c0_36, %c4, %c0_37], %30 {strides = array<i32>} : memref<2x16x32xf32, #tpu.memory_space<vmem>>, vector<2x1x32xf32>,
      %c0_38 = arith.constant 0 : index
      %c640 = arith.constant 640 : index
      %32 = vector.load %arg7[%c0_38, %c640] : memref<2x2176xf32, #tpu.memory_space<vmem>>, vector<2x32xf32>
      %33 = vector.shape_cast %32 : vector<2x32xf32> to vector<2x1x32xf32>
      %c0_39 = arith.constant 0 : index
      %c5 = arith.constant 5 : index
      %c0_40 = arith.constant 0 : index
      %34 = vector.load %arg8[%c0_39, %c5, %c0_40] : memref<2x16x32xf32, #tpu.memory_space<vmem>>, vector<2x1x32xf32>
      tpu.vector_store %arg8[%c0_39, %c5, %c0_40], %33 {strides = array<i32>} : memref<2x16x32xf32, #tpu.memory_space<vmem>>, vector<2x1x32xf32>,
      %c0_41 = arith.constant 0 : index
      %c768 = arith.constant 768 : index
      %35 = vector.load %arg7[%c0_41, %c768] : memref<2x2176xf32, #tpu.memory_space<vmem>>, vector<2x32xf32>
      %36 = vector.shape_cast %35 : vector<2x32xf32> to vector<2x1x32xf32>
      %c0_42 = arith.constant 0 : index
      %c6 = arith.constant 6 : index
      %c0_43 = arith.constant 0 : index
      %37 = vector.load %arg8[%c0_42, %c6, %c0_43] : memref<2x16x32xf32, #tpu.memory_space<vmem>>, vector<2x1x32xf32>
      tpu.vector_store %arg8[%c0_42, %c6, %c0_43], %36 {strides = array<i32>} : memref<2x16x32xf32, #tpu.memory_space<vmem>>, vector<2x1x32xf32>,
      %c0_44 = arith.constant 0 : index
      %c896 = arith.constant 896 : index
      %38 = vector.load %arg7[%c0_44, %c896] : memref<2x2176xf32, #tpu.memory_space<vmem>>, vector<2x32xf32>
      %39 = vector.shape_cast %38 : vector<2x32xf32> to vector<2x1x32xf32>
      %c0_45 = arith.constant 0 : index
      %c7 = arith.constant 7 : index
      %c0_46 = arith.constant 0 : index
      %40 = vector.load %arg8[%c0_45, %c7, %c0_46] : memref<2x16x32xf32, #tpu.memory_space<vmem>>, vector<2x1x32xf32>
      tpu.vector_store %arg8[%c0_45, %c7, %c0_46], %39 {strides = array<i32>} : memref<2x16x32xf32, #tpu.memory_space<vmem>>, vector<2x1x32xf32>,
      %c0_47 = arith.constant 0 : index
      %c1024 = arith.constant 1024 : index
      %41 = vector.load %arg7[%c0_47, %c1024] : memref<2x2176xf32, #tpu.memory_space<vmem>>, vector<2x32xf32>
      %42 = vector.shape_cast %41 : vector<2x32xf32> to vector<2x1x32xf32>
      %c0_48 = arith.constant 0 : index
      %c8 = arith.constant 8 : index
      %c0_49 = arith.constant 0 : index
      %43 = vector.load %arg8[%c0_48, %c8, %c0_49] : memref<2x16x32xf32, #tpu.memory_space<vmem>>, vector<2x1x32xf32>
      tpu.vector_store %arg8[%c0_48, %c8, %c0_49], %42 {strides = array<i32>} : memref<2x16x32xf32, #tpu.memory_space<vmem>>, vector<2x1x32xf32>,
      %c0_50 = arith.constant 0 : index
      %c1152 = arith.constant 1152 : index
      %44 = vector.load %arg7[%c0_50, %c1152] : memref<2x2176xf32, #tpu.memory_space<vmem>>, vector<2x32xf32>
      %45 = vector.shape_cast %44 : vector<2x32xf32> to vector<2x1x32xf32>
      %c0_51 = arith.constant 0 : index
      %c9 = arith.constant 9 : index
      %c0_52 = arith.constant 0 : index
      %46 = vector.load %arg8[%c0_51, %c9, %c0_52] : memref<2x16x32xf32, #tpu.memory_space<vmem>>, vector<2x1x32xf32>
      tpu.vector_store %arg8[%c0_51, %c9, %c0_52], %45 {strides = array<i32>} : memref<2x16x32xf32, #tpu.memory_space<vmem>>, vector<2x1x32xf32>,
      %c0_53 = arith.constant 0 : index
      %c1280 = arith.constant 1280 : index
      %47 = vector.load %arg7[%c0_53, %c1280] : memref<2x2176xf32, #tpu.memory_space<vmem>>, vector<2x32xf32>
      %48 = vector.shape_cast %47 : vector<2x32xf32> to vector<2x1x32xf32>
      %c0_54 = arith.constant 0 : index
      %c10 = arith.constant 10 : index
      %c0_55 = arith.constant 0 : index
      %49 = vector.load %arg8[%c0_54, %c10, %c0_55] : memref<2x16x32xf32, #tpu.memory_space<vmem>>, vector<2x1x32xf32>
      tpu.vector_store %arg8[%c0_54, %c10, %c0_55], %48 {strides = array<i32>} : memref<2x16x32xf32, #tpu.memory_space<vmem>>, vector<2x1x32xf32>,
      %c0_56 = arith.constant 0 : index
      %c1408 = arith.constant 1408 : index
      %50 = vector.load %arg7[%c0_56, %c1408] : memref<2x2176xf32, #tpu.memory_space<vmem>>, vector<2x32xf32>
      %51 = vector.shape_cast %50 : vector<2x32xf32> to vector<2x1x32xf32>
      %c0_57 = arith.constant 0 : index
      %c11 = arith.constant 11 : index
      %c0_58 = arith.constant 0 : index
      %52 = vector.load %arg8[%c0_57, %c11, %c0_58] : memref<2x16x32xf32, #tpu.memory_space<vmem>>, vector<2x1x32xf32>
      tpu.vector_store %arg8[%c0_57, %c11, %c0_58], %51 {strides = array<i32>} : memref<2x16x32xf32, #tpu.memory_space<vmem>>, vector<2x1x32xf32>,
      %c0_59 = arith.constant 0 : index
      %c1536 = arith.constant 1536 : index
      %53 = vector.load %arg7[%c0_59, %c1536] : memref<2x2176xf32, #tpu.memory_space<vmem>>, vector<2x32xf32>
      %54 = vector.shape_cast %53 : vector<2x32xf32> to vector<2x1x32xf32>
      %c0_60 = arith.constant 0 : index
      %c12 = arith.constant 12 : index
      %c0_61 = arith.constant 0 : index
      %55 = vector.load %arg8[%c0_60, %c12, %c0_61] : memref<2x16x32xf32, #tpu.memory_space<vmem>>, vector<2x1x32xf32>
      tpu.vector_store %arg8[%c0_60, %c12, %c0_61], %54 {strides = array<i32>} : memref<2x16x32xf32, #tpu.memory_space<vmem>>, vector<2x1x32xf32>,
      %c0_62 = arith.constant 0 : index
      %c1664 = arith.constant 1664 : index
      %56 = vector.load %arg7[%c0_62, %c1664] : memref<2x2176xf32, #tpu.memory_space<vmem>>, vector<2x32xf32>
      %57 = vector.shape_cast %56 : vector<2x32xf32> to vector<2x1x32xf32>
      %c0_63 = arith.constant 0 : index
      %c13 = arith.constant 13 : index
      %c0_64 = arith.constant 0 : index
      %58 = vector.load %arg8[%c0_63, %c13, %c0_64] : memref<2x16x32xf32, #tpu.memory_space<vmem>>, vector<2x1x32xf32>
      tpu.vector_store %arg8[%c0_63, %c13, %c0_64], %57 {strides = array<i32>} : memref<2x16x32xf32, #tpu.memory_space<vmem>>, vector<2x1x32xf32>,
      %c0_65 = arith.constant 0 : index
      %c1792 = arith.constant 1792 : index
      %59 = vector.load %arg7[%c0_65, %c1792] : memref<2x2176xf32, #tpu.memory_space<vmem>>, vector<2x32xf32>
      %60 = vector.shape_cast %59 : vector<2x32xf32> to vector<2x1x32xf32>
      %c0_66 = arith.constant 0 : index
      %c14 = arith.constant 14 : index
      %c0_67 = arith.constant 0 : index
      %61 = vector.load %arg8[%c0_66, %c14, %c0_67] : memref<2x16x32xf32, #tpu.memory_space<vmem>>, vector<2x1x32xf32>
      tpu.vector_store %arg8[%c0_66, %c14, %c0_67], %60 {strides = array<i32>} : memref<2x16x32xf32, #tpu.memory_space<vmem>>, vector<2x1x32xf32>,
      %c0_68 = arith.constant 0 : index
      %c1920 = arith.constant 1920 : index
      %62 = vector.load %arg7[%c0_68, %c1920] : memref<2x2176xf32, #tpu.memory_space<vmem>>, vector<2x32xf32>
      %63 = vector.shape_cast %62 : vector<2x32xf32> to vector<2x1x32xf32>
      %c0_69 = arith.constant 0 : index
      %c15 = arith.constant 15 : index
      %c0_70 = arith.constant 0 : index
      %64 = vector.load %arg8[%c0_69, %c15, %c0_70] : memref<2x16x32xf32, #tpu.memory_space<vmem>>, vector<2x1x32xf32>
      tpu.vector_store %arg8[%c0_69, %c15, %c0_70], %63 {strides = array<i32>} : memref<2x16x32xf32, #tpu.memory_space<vmem>>, vector<2x1x32xf32>,
      %c0_71 = arith.constant 0 : index
      %c2048 = arith.constant 2048 : index
      %65 = vector.load %arg7[%c0_71, %c2048] : memref<2x2176xf32, #tpu.memory_space<vmem>>, vector<2x32xf32>
      %66 = vector.shape_cast %65 : vector<2x32xf32> to vector<2x1x32xf32>
      %c0_72 = arith.constant 0 : index
      %c0_73 = arith.constant 0 : index
      %c0_74 = arith.constant 0 : index
      %67 = vector.load %arg9[%c0_72, %c0_73, %c0_74] : memref<2x1x32xf32, #tpu.memory_space<vmem>>, vector<2x1x32xf32>
      tpu.vector_store %arg9[%c0_72, %c0_73, %c0_74], %66 {strides = array<i32>} : memref<2x1x32xf32, #tpu.memory_space<vmem>>, vector<2x1x32xf32>,
    } else {
    }
    %c0 = arith.constant 0 : index
    %c0_1 = arith.constant 0 : index
    %c0_2 = arith.constant 0 : index
    %3 = vector.load %arg8[%c0, %c0_1, %c0_2] : memref<2x16x32xf32, #tpu.memory_space<vmem>>, vector<2x16x32xf32>
    %c0_3 = arith.constant 0 : index
    %c0_4 = arith.constant 0 : index
    %c0_5 = arith.constant 0 : index
    %4 = vector.load %arg5[%c0_3, %c0_4, %c0_5] : memref<2x8x16xf32, #tpu.memory_space<vmem>>, vector<2x8x16xf32>
    "tpu.trace_start"() <{level = 10 : i32, message = "bsd,bde->bse"}> : () -> ()
    %cst = arith.constant dense<0.000000e+00> : vector<2x8x32xf32>
    %5 = tpu.matmul %4, %3, %cst {dimension_numbers = #tpu.dot_dimension_numbers<[2], [1], [1], [2], [0, 0, 0, 1, 1, 2], [0], [0]>} : vector<2x8x16xf32>, vector<2x16x32xf32>, vector<2x8x32xf32> -> vector<2x8x32xf32>
    "tpu.trace_stop"() : () -> ()
    %c0_6 = arith.constant 0 : index
    %c0_7 = arith.constant 0 : index
    %c0_8 = arith.constant 0 : index
    %6 = vector.load %arg9[%c0_6, %c0_7, %c0_8] : memref<2x1x32xf32, #tpu.memory_space<vmem>>, vector<2x1x32xf32>
    %7 = vector.broadcast %6 : vector<2x1x32xf32> to vector<2x8x32xf32>
    %8 = arith.addf %5, %7 : vector<2x8x32xf32>
    %c0_9 = arith.constant 0 : index
    %c0_10 = arith.constant 0 : index
    %c0_11 = arith.constant 0 : index
    %9 = vector.load %arg6[%c0_9, %c0_10, %c0_11] : memref<2x8x32xf32, #tpu.memory_space<vmem>>, vector<2x8x32xf32>
    tpu.vector_store %arg6[%c0_9, %c0_10, %c0_11], %8 {strides = array<i32>} : memref<2x8x32xf32, #tpu.memory_space<vmem>>, vector<2x8x32xf32>,
    return
  }
  func.func @transform_0(%arg0: i32, %arg1: i32) -> (i32, i32) {
    %c0_i32 = arith.constant 0 : i32
    %c0_i32_0 = arith.constant 0 : i32
    return %arg0, %c0_i32 : i32, i32
  }
  func.func @transform_1(%arg0: i32, %arg1: i32) -> (i32, i32) {
    %c0_i32 = arith.constant 0 : i32
    %c0_i32_0 = arith.constant 0 : i32
    %c0_i32_1 = arith.constant 0 : i32
    return %c0_i32, %c0_i32_0 : i32, i32
  }
  func.func @transform_2(%arg0: i32, %arg1: i32) -> (i32, i32) {
    %c0_i32 = arith.constant 0 : i32
    %c0_i32_0 = arith.constant 0 : i32
    %c0_i32_1 = arith.constant 0 : i32
    return %c0_i32, %c0_i32_0 : i32, i32
  }
  func.func @transform_3(%arg0: i32, %arg1: i32) -> (i32, i32, i32) {
    %c0_i32 = arith.constant 0 : i32
    %c0_i32_0 = arith.constant 0 : i32
    return %arg0, %arg1, %c0_i32 : i32, i32, i32
  }
  func.func @transform_4(%arg0: i32, %arg1: i32) -> (i32, i32, i32) {
    %c0_i32 = arith.constant 0 : i32
    %c0_i32_0 = arith.constant 0 : i32
    return %arg0, %arg1, %c0_i32 : i32, i32, i32
  }
}

</mosaic_0001>

<bundles_post_ra>
// kernel: tpu_custom_call.1
= control target key start
LH: loop header
LB: loop body
LE: loop exit
PB: predicated region body
PF: predicated region fallthrough
CT: control target
= control target key end

     0   :  { %9 = vsyncpa [#allocation6], 0  ;;  %s1727_s0 = inlined_call_operand.hbm [shape: f32[2,24], index: 0, kind: input, shape index: {}]   ;;  %s1728_s1 = inlined_call_operand.hbm [shape: f32[24,2176], index: 1, kind: input, shape index: {}]   ;;  %s1729_s2 = inlined_call_operand.hbm [shape: f32[1,2176], index: 2, kind: input, shape index: {}]   ;;  %s1730_s3 = inlined_call_operand.hbm [shape: f32[2,8,16], index: 3, kind: input, shape index: {}]   ;;  %s1731_s4 = inlined_call_operand.hbm [shape: f32[2,8,32], index: 4, kind: output, shape index: {}]  }
   0x1   :  { %10 = vsyncpa [#allocation9], 0 }
   0x2   :  { %11 = vsyncpa [#allocation12], 0 }
   0x3   :  { %12 = vsyncpa [#allocation7], 0  ;;  %s1573_s15 = smov [#allocation8]  }
   0x4   :  { %s28_s16 = sshll.u32 %s1573_s15, 4  ;;  %s29_s16 = int_to_ptr.vmem [resolvable:$true] %s28_s16 }
   0x5   :  { %s1473_s17 = scalar_lea.vmem %s29_s16, 6528  ;;  %p1478_p1 = scmp.lt.s32.totalorder %s29_s16, %s29_s16 }
   0x6   :  { %p1474_p0 = scmp.ne.s32.totalorder %s29_s16, %s1473_s17  ;;  %p1479_p2 = scmp.lt.s32.totalorder %s1473_s17, %s1473_s17 }
   0x8   :  { %p1480_p3 = por %p1479_p2, %p1478_p1 }
   0xa   :  { %p1481_p4 = pnand %p1480_p3, %p1474_p0 }
   0xc   :  { %1484 = shalt.err (!%p1481_p4)
}
   0xd   :  { %s1574_s18 = smov 2176   ;;  %s1575_s19 = smov 136  }
   0xe   :  { %34 = dma.hbm_to_vmem [thread:$0]  %s1728_s1, 6528, %s29_s16, [#allocation9], %s1574_s18, %s1574_s18, %s1575_s19  }
   0xf   :  { %s1576_s22 = smov [#allocation5]   ;;  %s1577_s24 = smov [#allocation10]  }
  0x10   :  { %s19_s23 = sshll.u32 %s1576_s22, 4  ;;  %s41_s25 = sshll.u32 %s1577_s24, 4  ;;  %s20_s23 = int_to_ptr.vmem [resolvable:$true] %s19_s23  ;;  %s42_s25 = int_to_ptr.vmem [resolvable:$true] %s41_s25 }
  0x11   :  { %s1493_s26 = scalar_lea.vmem %s20_s23, 32  ;;  %p1498_p6 = scmp.lt.s32.totalorder %s20_s23, %s20_s23 }
  0x12   :  { %p1494_p5 = scmp.ne.s32.totalorder %s20_s23, %s1493_s26  ;;  %p1499_p7 = scmp.lt.s32.totalorder %s1493_s26, %s1493_s26 }
  0x14   :  { %p1500_p8 = por %p1499_p7, %p1498_p6 }
  0x16   :  { %p1501_p9 = pnand %p1500_p8, %p1494_p5 }
  0x18   :  { %1504 = shalt.err (!%p1501_p9)
}
  0x19   :  { %22 = dma.hbm_to_vmem [thread:$0]  %s1727_s0, 32, %s20_s23, [#allocation6]  }
  0x1a   :  { %s1513_s29 = scalar_lea.vmem %s42_s25, 272  ;;  %s1517_s1 = scalar_lea.vmem %s42_s25, 288 }
  0x1b   :  { %p1514_p10 = scmp.ne.s32.totalorder %s42_s25, %s1513_s29  ;;  %p1518_p11 = scmp.lt.s32.totalorder %s42_s25, %s42_s25 }
  0x1c   :  { %p1519_p12 = scmp.lt.s32.totalorder %s1517_s1, %s1513_s29 }
  0x1e   :  { %p1520_p13 = por %p1519_p12, %p1518_p11 }
  0x20   :  { %p1521_p0 = pnand %p1520_p13, %p1514_p10 }
  0x22   :  { %1524 = shalt.err (!%p1521_p0)
}
  0x23   :  { %44 = dma.hbm_to_vmem [thread:$0]  %s1729_s2, 272, %s42_s25, [#allocation9]  }
  0x24   :  { %s1578_s6 = smov [#allocation11]  }
  0x25   :  { %s50_s7 = sshll.u32 %s1578_s6, 4  ;;  %s51_s7 = int_to_ptr.vmem [resolvable:$true] %s50_s7 }
  0x26   :  { %s1533_s8 = scalar_lea.vmem %s51_s7, 256  ;;  %p1538_p2 = scmp.lt.s32.totalorder %s51_s7, %s51_s7 }
  0x27   :  { %p1534_p1 = scmp.ne.s32.totalorder %s51_s7, %s1533_s8  ;;  %p1539_p3 = scmp.lt.s32.totalorder %s1533_s8, %s1533_s8 }
  0x29   :  { %p1540_p4 = por %p1539_p3, %p1538_p2 }
  0x2b   :  { %p1541_p5 = pnand %p1540_p4, %p1534_p1 }
  0x2d   :  { %1544 = shalt.err (!%p1541_p5)
}
  0x2e   :  { %s1579_s0 = smov 128   ;;  %s1580_s9 = smov 8  }
  0x2f   :  { %56 = dma.hbm_to_vmem [thread:$0]  %s1730_s3, 256, %s51_s7, [#allocation12], %s1579_s0, %s1579_s0, %s1580_s9  }
  0x30   :  { %1565 = dma.done.wait [#allocation6], 32  }
  0x31   :  { %1566 = vsyncadd [#allocation6], 4294967264 }
  0x32   :  { %1567 = dma.done.wait [#allocation9], 6800  }
  0x33   :  { %1568 = vsyncadd [#allocation9], 4294960496 }
  0x34   :  { %1569 = dma.done.wait [#allocation12], 256  }
  0x35   :  { %1570 = vsyncadd [#allocation12], 4294967040  ;;  %v1581_v0 = vmov 0.0   ;;  %v109_v1 = vld [vmem:[#allocation8 + $0x118] sm:$0xff]  ;;  %v111_v2 = vld [vmem:[#allocation8 + $0x128] sm:$0xff]  ;;  %vm216_vm0 = vcmask 195584   ;;  %v131_v53 = vlaneseq }
  0x36   :  { %284 = vmatprep.mubr.f32.mxu0 %v1581_v0  ;;  %355 = vmatprep.mubr.f32.mxu1 %v1581_v0  ;;  %v108_v3 = vld [vmem:[#allocation8 + $0x110] sm:$0xff]  ;;  %v110_v4 = vld [vmem:[#allocation8 + $0x120] sm:$0xff]  ;;  %v91_v7 = vld [vmem:[#allocation8 + $0x88] sm:$0xff]  ;;  %vm1582_vm1 = vmmov 0   ;;  %v1583_v58 = vmov 1983009808  }
  0x37   :  { %246 = vmatprep.subr.mxu0 %v109_v1  ;;  %317 = vmatprep.subr.mxu1 %v111_v2  ;;  %v92_v5 = vld [vmem:[#allocation8 + $0x90] sm:$0xff]  ;;  %v94_v6 = vld [vmem:[#allocation8 + $0xa0] sm:$0xff]  ;;  %v93_v8 = vld [vmem:[#allocation8 + $0x98] sm:$0xff]  ;;  %v1661_v54 = vshrl.u32 %v131_v53, 7  ;;  %v878_v59 = vunpack.c.l.s4 %v1583_v58  ;;  %vm972_vm2 = vcmask 253952   ;;  %vm1219_vm3 = vcmask 130048  }
  0x38   :  { %247 = vmatpush1.msra.mxu0 %v108_v3  ;;  %318 = vmatpush1.msra.mxu1 %v110_v4  ;;  %v75_v9 = vld [vmem:[#allocation8 + $0x8] sm:$0xff]  ;;  %v77_v10 = vld [vmem:[#allocation8 + $0x18] sm:$0xff]  ;;  %v74_v11 = vld [vmem:[#allocation8] sm:$0xff]  ;;  %vm1366_vm4 = vcmask 261120   ;;  %s1584_s2 = smov [#allocation13]  }
  0x39   :  { %248 = vmatprep.subr.mxu0 %v92_v5  ;;  %319 = vmatprep.subr.mxu1 %v94_v6  ;;  %v76_v12 = vld [vmem:[#allocation8 + $0x10] sm:$0xff]  ;;  %v1627_v13 = vld [vmem:[#allocation5] sm:$0x3]  ;;  %v115_v15 = vld [vmem:[#allocation8 + $0x148] sm:$0xff]  ;;  %v133_v55 = vsub.s32 0, %v1661_v54  ;;  %v141_v56 = vsub.s32 2, %v1661_v54  ;;  %v879_v1 = vunpack.c.0.s8 %v878_v59 }
  0x3a   :  { %249 = vmatpush1.msra.mxu0 %v91_v7  ;;  %320 = vmatpush1.msra.mxu1 %v93_v8  ;;  %v113_v14 = vld [vmem:[#allocation8 + $0x138] sm:$0xff]  ;;  %v112_v16 = vld [vmem:[#allocation8 + $0x130] sm:$0xff]  ;;  %v114_v17 = vld [vmem:[#allocation8 + $0x140] sm:$0xff]  ;;  %v137_v60 = vsub.s32 1, %v1661_v54  ;;  %v145_v61 = vsub.s32 3, %v1661_v54  ;;  %v149_v8 = vsub.s32 4, %v1661_v54 }
  0x3b   :  { %250 = vmatprep.subr.mxu0 %v75_v9  ;;  %321 = vmatprep.subr.mxu1 %v77_v10  ;;  %v96_v18 = vld [vmem:[#allocation8 + $0xb0] sm:$0xff]  ;;  %v98_v19 = vld [vmem:[#allocation8 + $0xc0] sm:$0xff]  ;;  %v95_v20 = vld [vmem:[#allocation8 + $0xa8] sm:$0xff]  ;;  %v157_v9 = vsub.s32 6, %v1661_v54  ;;  %s1374_s3 = sshll.u32 %s1584_s2, 4  ;;  %s1375_s3 = int_to_ptr.vmem [resolvable:$true] %s1374_s3 }
  0x3c   :  { %251 = vmatpush1.msra.mxu0 %v74_v11  ;;  %322 = vmatpush1.msra.mxu1 %v76_v12  ;;  %v97_v21 = vld [vmem:[#allocation8 + $0xb8] sm:$0xff]  ;;  %v79_v22 = vld [vmem:[#allocation8 + $0x28] sm:$0xff]  ;;  %v78_v24 = vld [vmem:[#allocation8 + $0x20] sm:$0xff]  ;;  %v1670_v11 = vsub.s32 %v879_v1, %v1661_v54  ;;  %s1545_s12 = scalar_lea.vmem %s1375_s3, 256  ;;  %p1550_p7 = scmp.lt.s32.totalorder %s1375_s3, %s1375_s3 }
  0x3d   :  { %1389 = vmatmul.mubr.msk.f32.vlgmr.msra.gmra.mxu0 %vm216_vm0, %v1627_v13  ;;  %1390 = vmatmul.mubr.msk.f32.vlgmr.msra.gmra.mxu1 %vm216_vm0, %v1627_v13  ;;  %v81_v23 = vld [vmem:[#allocation8 + $0x38] sm:$0xff]  ;;  %v80_v25 = vld [vmem:[#allocation8 + $0x30] sm:$0xff]  ;;  %v119_v27 = vld [vmem:[#allocation8 + $0x168] sm:$0xff]  ;;  %p1546_p6 = scmp.ne.s32.totalorder %s1375_s3, %s1545_s12  ;;  %p1551_p8 = scmp.lt.s32.totalorder %s1545_s12, %s1545_s12 }
  0x3e   :  { %388 = vmatprep.subr.mxu0 %v113_v14  ;;  %459 = vmatprep.subr.mxu1 %v115_v15  ;;  %v117_v26 = vld [vmem:[#allocation8 + $0x158] sm:$0xff]  ;;  %v116_v28 = vld [vmem:[#allocation8 + $0x150] sm:$0xff]  ;;  %v118_v29 = vld [vmem:[#allocation8 + $0x160] sm:$0xff]  ;;  %v153_v15 = vsub.s32 5, %v1661_v54 }
  0x3f   :  { %389 = vmatpush1.msra.mxu0 %v112_v16  ;;  %460 = vmatpush1.msra.mxu1 %v114_v17  ;;  %v100_v30 = vld [vmem:[#allocation8 + $0xd0] sm:$0xff]  ;;  %v102_v31 = vld [vmem:[#allocation8 + $0xe0] sm:$0xff]  ;;  %v99_v32 = vld [vmem:[#allocation8 + $0xc8] sm:$0xff]  ;;  %v161_v16 = vsub.s32 7, %v1661_v54  ;;  %p1552_p9 = por %p1551_p8, %p1550_p7 }
  0x40   :  { %390 = vmatprep.subr.mxu0 %v96_v18  ;;  %461 = vmatprep.subr.mxu1 %v98_v19  ;;  %v101_v33 = vld [vmem:[#allocation8 + $0xd8] sm:$0xff]  ;;  %v83_v34 = vld [vmem:[#allocation8 + $0x48] sm:$0xff]  ;;  %v82_v36 = vld [vmem:[#allocation8 + $0x40] sm:$0xff] }
  0x41   :  { %391 = vmatpush1.msra.mxu0 %v95_v20  ;;  %462 = vmatpush1.msra.mxu1 %v97_v21  ;;  %v85_v35 = vld [vmem:[#allocation8 + $0x58] sm:$0xff]  ;;  %v84_v37 = vld [vmem:[#allocation8 + $0x50] sm:$0xff]  ;;  %v123_v39 = vld [vmem:[#allocation8 + $0x188] sm:$0xff]  ;;  %p1553_p10 = pnand %p1552_p9, %p1546_p6 }
  0x42   :  { %392 = vmatprep.subr.mxu0 %v79_v22  ;;  %463 = vmatprep.subr.mxu1 %v81_v23  ;;  %v121_v38 = vld [vmem:[#allocation8 + $0x178] sm:$0xff]  ;;  %v120_v40 = vld [vmem:[#allocation8 + $0x170] sm:$0xff]  ;;  %v122_v41 = vld [vmem:[#allocation8 + $0x180] sm:$0xff] }
  0x43   :  { %393 = vmatpush1.msra.mxu0 %v78_v24  ;;  %426 = vmatprep.mubr.f32.mxu0 %v1581_v0  ;;  %v104_v42 = vld [vmem:[#allocation8 + $0xf0] sm:$0xff]  ;;  %v106_v43 = vld [vmem:[#allocation8 + $0x100] sm:$0xff]  ;;  %v103_v44 = vld [vmem:[#allocation8 + $0xe8] sm:$0xff] }
  0x44   :  { %464 = vmatpush1.msra.mxu1 %v80_v25  ;;  %497 = vmatprep.mubr.f32.mxu1 %v1581_v0  ;;  %v105_v45 = vld [vmem:[#allocation8 + $0xf8] sm:$0xff]  ;;  %v87_v46 = vld [vmem:[#allocation8 + $0x68] sm:$0xff]  ;;  %v86_v48 = vld [vmem:[#allocation8 + $0x60] sm:$0xff] }
  0x45   :  { %1391 = vmatmul.mubr.msk.f32.vlgmr.msra.gmra.mxu0 %vm216_vm0, %v1627_v13  ;;  %1392 = vmatmul.mubr.msk.f32.vlgmr.msra.gmra.mxu1 %vm216_vm0, %v1627_v13  ;;  %v89_v47 = vld [vmem:[#allocation8 + $0x78] sm:$0xff]  ;;  %v88_v49 = vld [vmem:[#allocation8 + $0x70] sm:$0xff]  ;;  %v107_v51 = vld [vmem:[#allocation8 + $0x108] sm:$0xff] }
  0x46   :  { %530 = vmatprep.subr.mxu0 %v117_v26  ;;  %601 = vmatprep.subr.mxu1 %v119_v27  ;;  %v124_v50 = vld [vmem:[#allocation8 + $0x190] sm:$0xff]  ;;  %v90_v52 = vld [vmem:[#allocation8 + $0x80] sm:$0xff]  ;;  %v125_v57 = vld [vmem:[#allocation10] sm:$0xff] }
  0x47   :  { %531 = vmatpush1.msra.mxu0 %v116_v28  ;;  %602 = vmatpush1.msra.mxu1 %v118_v29  ;;  %v134_v62 = vrot.slane %v125_v57, %v133_v55  ;;  %v142_v63 = vrot.slane %v125_v57, %v141_v56  ;;  %v138_v2 = vrot.slane %v125_v57, %v137_v60 }
  0x48   :  { %532 = vmatprep.subr.mxu0 %v100_v30  ;;  %603 = vmatprep.subr.mxu1 %v102_v31  ;;  %v146_v3 = vrot.slane %v125_v57, %v145_v61  ;;  %v150_v19 = vrot.slane %v125_v57, %v149_v8  ;;  %v158_v20 = vrot.slane %v125_v57, %v157_v9 }
  0x49   :  { %533 = vmatpush1.msra.mxu0 %v99_v32  ;;  %604 = vmatpush1.msra.mxu1 %v101_v33  ;;  %v154_v23 = vrot.slane %v125_v57, %v153_v15  ;;  %v162_v24 = vrot.slane %v125_v57, %v161_v16  ;;  %v126_v32 = vld [vmem:[#allocation10 + $0x8] sm:$0xff] }
  0x4a   :  { %534 = vmatprep.subr.mxu0 %v83_v34  ;;  %605 = vmatprep.subr.mxu1 %v85_v35 }
  0x4b   :  { %535 = vmatpush1.msra.mxu0 %v82_v36  ;;  %568 = vmatprep.mubr.f32.mxu0 %v1581_v0 }
  0x4c   :  { %606 = vmatpush1.msra.mxu1 %v84_v37  ;;  %639 = vmatprep.mubr.f32.mxu1 %v1581_v0  ;;  %v166_v37 = vrot.slane %v126_v32, %v133_v55 }
  0x4d   :  { %1393 = vmatmul.mubr.msk.f32.vlgmr.msra.gmra.mxu0 %vm216_vm0, %v1627_v13  ;;  %1394 = vmatmul.mubr.msk.f32.vlgmr.msra.gmra.mxu1 %vm216_vm0, %v1627_v13 }
  0x4e   :  { %672 = vmatprep.subr.mxu0 %v121_v38  ;;  %743 = vmatprep.subr.mxu1 %v123_v39  ;;  %v174_v38 = vrot.slane %v126_v32, %v141_v56 }
  0x4f   :  { %673 = vmatpush1.msra.mxu0 %v120_v40  ;;  %744 = vmatpush1.msra.mxu1 %v122_v41  ;;  %v170_v41 = vrot.slane %v126_v32, %v137_v60 }
  0x50   :  { %674 = vmatprep.subr.mxu0 %v104_v42  ;;  %745 = vmatprep.subr.mxu1 %v106_v43  ;;  %v178_v42 = vrot.slane %v126_v32, %v145_v61  ;;  %v182_v61 = vrot.slane %v126_v32, %v149_v8 }
  0x51   :  { %675 = vmatpush1.msra.mxu0 %v103_v44  ;;  %746 = vmatpush1.msra.mxu1 %v105_v45 }
  0x52   :  { %676 = vmatprep.subr.mxu0 %v87_v46  ;;  %747 = vmatprep.subr.mxu1 %v89_v47 }
  0x53   :  { %677 = vmatpush1.msra.mxu0 %v86_v48  ;;  %710 = vmatprep.mubr.f32.mxu0 %v1581_v0 }
  0x54   :  { %748 = vmatpush1.msra.mxu1 %v88_v49  ;;  %781 = vmatprep.mubr.f32.mxu1 %v1581_v0 }
  0x55   :  { %1395 = vmatmul.mubr.msk.f32.vlgmr.msra.gmra.mxu0 %vm216_vm0, %v1627_v13  ;;  %1396 = vmatmul.mubr.msk.f32.vlgmr.msra.gmra.mxu1 %vm216_vm0, %v1627_v13 }
  0x56   :  { %1430 = vmatprep.subr.mxu0 %v1581_v0  ;;  %1439 = vmatprep.subr.mxu1 %v1581_v0 }
  0x57   :  { %1431 = vmatpush3.msra.mxu0 %v124_v50  ;;  %1436 = vmatprep.mubr.msk.f32.mxu0 %vm1582_vm1, %v1581_v0 }
  0x58   :  { %1432 = vmatprep.subr.mxu0 %v1581_v0  ;;  %1443 = vmatprep.mubr.msk.f32.mxu1 %vm1582_vm1, %v1581_v0 }
  0x59   :  { %1433 = vmatpush3.msra.mxu0 %v107_v51 }
  0x5a   :  { %1434 = vmatprep.subr.mxu0 %v1581_v0 }
  0x5b   :  { %1435 = vmatpush3.msra.mxu0 %v90_v52 }
  0x5c   :  { %1437 = vmatmul.mubr.msk.f32.vlgmr.msra.gmra.mxu0 %vm216_vm0, %v1627_v13 }
  0xfd   :  { %v286_v4 = vpop.f32.mrf.mxu0  ;;  %v357_v5 = vpop.f32.mrf.mxu1 }
  0xfe   :  { %v287_v6 = vadd.f32 %v286_v4, %v134_v62  ;;  %v358_v7 = vadd.f32 %v357_v5, %v142_v63  ;;  %v190_v62 = vrot.slane %v126_v32, %v157_v9  ;;  %v194_v4 = vrot.slane %v126_v32, %v161_v16 }
  0xff   :  { %v288_v10 = vpop.f32.mrf.mxu0  ;;  %v359_v12 = vpop.f32.mrf.mxu1 }
 0x100   :  { %v289_v13 = vadd.f32 %v288_v10, %v138_v2  ;;  %v360_v14 = vadd.f32 %v359_v12, %v146_v3  ;;  %v186_v3 = vrot.slane %v126_v32, %v153_v15 }
 0x102   :  { %v875_v17 = vcombine.low %v287_v6, %v289_v13  ;;  %v876_v18 = vcombine.low %v358_v7, %v360_v14 }
 0x104   :  { %v883_v21 = vrot.slane %v875_v17, %v1670_v11  ;;  %v890_v22 = vrot.slane %v876_v18, %v1670_v11 }
 0x105   :  { %v428_v25 = vpop.f32.mrf.mxu0  ;;  %v499_v26 = vpop.f32.mrf.mxu1 }
 0x106   :  { %v891_v27 = vcombine.low %v883_v21, %v890_v22  ;;  %v429_v28 = vadd.f32 %v428_v25, %v150_v19  ;;  %v500_v29 = vadd.f32 %v499_v26, %v158_v20 }
 0x107   :  { %v430_v30 = vpop.f32.mrf.mxu0  ;;  %v501_v31 = vpop.f32.mrf.mxu1 }
 0x108   :  { %955 = vst [vmem:[#allocation2] sm:$0xff] %v891_v27  ;;  %v431_v33 = vadd.f32 %v430_v30, %v154_v23  ;;  %v502_v34 = vadd.f32 %v501_v31, %v162_v24 }
 0x10a   :  { %v892_v35 = vcombine.low %v429_v28, %v431_v33  ;;  %v893_v36 = vcombine.low %v500_v29, %v502_v34 }
 0x10c   :  { %v900_v39 = vrot.slane %v892_v35, %v1670_v11  ;;  %v907_v40 = vrot.slane %v893_v36, %v1670_v11 }
 0x10d   :  { %v570_v43 = vpop.f32.mrf.mxu0  ;;  %v641_v44 = vpop.f32.mrf.mxu1 }
 0x10e   :  { %v908_v45 = vcombine.low %v900_v39, %v907_v40  ;;  %v571_v46 = vadd.f32 %v570_v43, %v166_v37  ;;  %v642_v47 = vadd.f32 %v641_v44, %v174_v38  ;;  %v1203_v44 = vld [vmem:[#allocation11] sm:$0xff] }
 0x10f   :  { %v572_v48 = vpop.f32.mrf.mxu0  ;;  %v643_v49 = vpop.f32.mrf.mxu1  ;;  %v1399_v50 = vld.sshfl [vmem:[#allocation2] sm:$0x11 pattern:$0x75316420] }
 0x110   :  { %956 = vst [vmem:[#allocation2 + $0x8] sm:$0xff] %v908_v45  ;;  %v573_v51 = vadd.f32 %v572_v48, %v170_v41  ;;  %v644_v52 = vadd.f32 %v643_v49, %v178_v42  ;;  %v969_v53 = vcombine.high %v1399_v50, %v1399_v50  ;;  %973 = vst.msk [vmem:[#allocation3] sm:$0x1] %vm972_vm2, %v1399_v50  ;;  %v1388_v49 = vld [vmem:[#allocation10 + $0x10] ss:$0 sm:$0xff] }
 0x111   :  { %v1400_v54 = vld.sshfl [vmem:[#allocation2 + $0x2] sm:$0x11 pattern:$0x75316420] }
 0x112   :  { %v984_v55 = vcombine.high %v1400_v54, %v1400_v54  ;;  %987 = vst.msk [vmem:[#allocation3 + $0x1] sm:$0x1] %vm972_vm2, %v1400_v54  ;;  %v1401_v56 = vld.sshfl [vmem:[#allocation2 + $0x4] sm:$0x11 pattern:$0x75316420]  ;;  %v909_v57 = vcombine.low %v571_v46, %v573_v51  ;;  %v910_v58 = vcombine.low %v642_v47, %v644_v52 }
 0x113   :  { %v998_v59 = vcombine.high %v1401_v56, %v1401_v56  ;;  %1001 = vst.msk [vmem:[#allocation3 + $0x2] sm:$0x1] %vm972_vm2, %v1401_v56  ;;  %v1402_v60 = vld.sshfl [vmem:[#allocation2 + $0x6] sm:$0x11 pattern:$0x75316420] }
 0x114   :  { %974 = vst.msk [vmem:[#allocation3 + $0x10] sm:$0x1] %vm972_vm2, %v969_v53  ;;  %v1012_v63 = vcombine.high %v1402_v60, %v1402_v60  ;;  %1015 = vst.msk [vmem:[#allocation3 + $0x3] sm:$0x1] %vm972_vm2, %v1402_v60  ;;  %v917_v1 = vrot.slane %v909_v57, %v1670_v11  ;;  %v924_v2 = vrot.slane %v910_v58, %v1670_v11  ;;  %v1204_v47 = vld [vmem:[#allocation11 + $0x8] sm:$0xff] }
 0x115   :  { %988 = vst.msk [vmem:[#allocation3 + $0x11] sm:$0x1] %vm972_vm2, %v984_v55  ;;  %1002 = vst.msk [vmem:[#allocation3 + $0x12] sm:$0x1] %vm972_vm2, %v998_v59  ;;  %v712_v5 = vpop.f32.mrf.mxu0  ;;  %v783_v6 = vpop.f32.mrf.mxu1 }
 0x116   :  { %1016 = vst.msk [vmem:[#allocation3 + $0x13] sm:$0x1] %vm972_vm2, %v1012_v63  ;;  %v925_v7 = vcombine.low %v917_v1, %v924_v2  ;;  %v713_v8 = vadd.f32 %v712_v5, %v182_v61  ;;  %v784_v13 = vadd.f32 %v783_v6, %v190_v62 }
 0x117   :  { %v714_v9 = vpop.f32.mrf.mxu0  ;;  %v785_v10 = vpop.f32.mrf.mxu1  ;;  %v1403_v12 = vld.sshfl [vmem:[#allocation2 + $0x8] sm:$0x11 pattern:$0x75316420] }
 0x118   :  { %957 = vst [vmem:[#allocation2 + $0x10] sm:$0xff] %v925_v7  ;;  %v715_v14 = vadd.f32 %v714_v9, %v186_v3  ;;  %v786_v17 = vadd.f32 %v785_v10, %v194_v4  ;;  %v1026_v18 = vcombine.high %v1403_v12, %v1403_v12  ;;  %1029 = vst.msk [vmem:[#allocation3 + $0x4] sm:$0x1] %vm972_vm2, %v1403_v12 }
 0x119   :  { %v1404_v15 = vld.sshfl [vmem:[#allocation2 + $0xa] sm:$0x11 pattern:$0x75316420] }
 0x11a   :  { %v1040_v16 = vcombine.high %v1404_v15, %v1404_v15  ;;  %1043 = vst.msk [vmem:[#allocation3 + $0x5] sm:$0x1] %vm972_vm2, %v1404_v15  ;;  %v1405_v19 = vld.sshfl [vmem:[#allocation2 + $0xc] sm:$0x11 pattern:$0x75316420]  ;;  %v926_v20 = vcombine.low %v713_v8, %v715_v14  ;;  %v927_v21 = vcombine.low %v784_v13, %v786_v17 }
 0x11b   :  { %v1054_v22 = vcombine.high %v1405_v19, %v1405_v19  ;;  %1057 = vst.msk [vmem:[#allocation3 + $0x6] sm:$0x1] %vm972_vm2, %v1405_v19  ;;  %v1406_v23 = vld.sshfl [vmem:[#allocation2 + $0xe] sm:$0x11 pattern:$0x75316420] }
 0x11c   :  { %1030 = vst.msk [vmem:[#allocation3 + $0x14] sm:$0x1] %vm972_vm2, %v1026_v18  ;;  %v1068_v24 = vcombine.high %v1406_v23, %v1406_v23  ;;  %1071 = vst.msk [vmem:[#allocation3 + $0x7] sm:$0x1] %vm972_vm2, %v1406_v23  ;;  %v934_v25 = vrot.slane %v926_v20, %v1670_v11  ;;  %v941_v26 = vrot.slane %v927_v21, %v1670_v11  ;;  %v854_v50 = vpop.f32.mrf.mxu0 }
 0x11d   :  { %1044 = vst.msk [vmem:[#allocation3 + $0x15] sm:$0x1] %vm972_vm2, %v1040_v16  ;;  %1058 = vst.msk [vmem:[#allocation3 + $0x16] sm:$0x1] %vm972_vm2, %v1054_v22  ;;  %v855_v51 = vadd.f32 %v1388_v49, %v854_v50 }
 0x11e   :  { %1072 = vst.msk [vmem:[#allocation3 + $0x17] sm:$0x1] %vm972_vm2, %v1068_v24  ;;  %v942_v27 = vcombine.low %v934_v25, %v941_v26  ;;  %v1438_v52 = vpop.f32.mrf.mxu0 }
 0x11f   :  { %v1407_v28 = vld.sshfl [vmem:[#allocation2 + $0x10] sm:$0x11 pattern:$0x75316420] }
 0x120   :  { %958 = vst [vmem:[#allocation2 + $0x18] sm:$0xff] %v942_v27  ;;  %v1082_v29 = vcombine.high %v1407_v28, %v1407_v28  ;;  %1085 = vst.msk [vmem:[#allocation3 + $0x8] sm:$0x1] %vm972_vm2, %v1407_v28 }
 0x121   :  { %v1408_v30 = vld.sshfl [vmem:[#allocation2 + $0x12] sm:$0x11 pattern:$0x75316420] }
 0x122   :  { %v1096_v31 = vcombine.high %v1408_v30, %v1408_v30  ;;  %1099 = vst.msk [vmem:[#allocation3 + $0x9] sm:$0x1] %vm972_vm2, %v1408_v30  ;;  %v1409_v32 = vld.sshfl [vmem:[#allocation2 + $0x14] sm:$0x11 pattern:$0x75316420] }
 0x123   :  { %v1110_v33 = vcombine.high %v1409_v32, %v1409_v32  ;;  %1113 = vst.msk [vmem:[#allocation3 + $0xa] sm:$0x1] %vm972_vm2, %v1409_v32  ;;  %v1410_v34 = vld.sshfl [vmem:[#allocation2 + $0x16] sm:$0x11 pattern:$0x75316420] }
 0x124   :  { %1086 = vst.msk [vmem:[#allocation3 + $0x18] sm:$0x1] %vm972_vm2, %v1082_v29  ;;  %v1124_v11 = vcombine.high %v1410_v34, %v1410_v34  ;;  %1127 = vst.msk [vmem:[#allocation3 + $0xb] sm:$0x1] %vm972_vm2, %v1410_v34  ;;  %v1199_v45 = vld [vmem:[#allocation3] sm:$0xff] }
 0x125   :  { %1100 = vst.msk [vmem:[#allocation3 + $0x19] sm:$0x1] %vm972_vm2, %v1096_v31  ;;  %1114 = vst.msk [vmem:[#allocation3 + $0x1a] sm:$0x1] %vm972_vm2, %v1110_v33  ;;  %v1201_v48 = vld [vmem:[#allocation3 + $0x10] sm:$0xff] }
 0x126   :  { %1128 = vst.msk [vmem:[#allocation3 + $0x1b] sm:$0x1] %vm972_vm2, %v1124_v11  ;;  %1398 = vst.sshfl [vmem:[#allocation2 + $0x20] sm:$0x3 pattern:$0x76325410] %v855_v51 }
 0x127   :  { %v1411_v35 = vld.sshfl [vmem:[#allocation2 + $0x18] sm:$0x11 pattern:$0x75316420] }
 0x128   :  { %v1138_v36 = vcombine.high %v1411_v35, %v1411_v35  ;;  %1141 = vst.msk [vmem:[#allocation3 + $0xc] sm:$0x1] %vm972_vm2, %v1411_v35  ;;  %v1412_v37 = vld.sshfl [vmem:[#allocation2 + $0x1a] sm:$0x11 pattern:$0x75316420] }
 0x129   :  { %v1152_v38 = vcombine.high %v1412_v37, %v1412_v37  ;;  %1155 = vst.msk [vmem:[#allocation3 + $0xd] sm:$0x1] %vm972_vm2, %v1412_v37  ;;  %v1413_v39 = vld.sshfl [vmem:[#allocation2 + $0x1c] sm:$0x11 pattern:$0x75316420] }
 0x12a   :  { %v1166_v40 = vcombine.high %v1413_v39, %v1413_v39  ;;  %1169 = vst.msk [vmem:[#allocation3 + $0xe] sm:$0x1] %vm972_vm2, %v1413_v39  ;;  %v1414_v41 = vld.sshfl [vmem:[#allocation2 + $0x1e] sm:$0x11 pattern:$0x75316420] }
 0x12b   :  { %1142 = vst.msk [vmem:[#allocation3 + $0x1c] sm:$0x1] %vm972_vm2, %v1138_v36  ;;  %v1180_v42 = vcombine.high %v1414_v41, %v1414_v41  ;;  %1183 = vst.msk [vmem:[#allocation3 + $0xf] sm:$0x1] %vm972_vm2, %v1414_v41 }
 0x12c   :  { %1156 = vst.msk [vmem:[#allocation3 + $0x1d] sm:$0x1] %vm972_vm2, %v1152_v38  ;;  %1170 = vst.msk [vmem:[#allocation3 + $0x1e] sm:$0x1] %vm972_vm2, %v1166_v40 }
 0x12d   :  { %1184 = vst.msk [vmem:[#allocation3 + $0x1f] sm:$0x1] %vm972_vm2, %v1180_v42  ;;  %v1415_v53 = vld.sshfl [vmem:[#allocation2 + $0x20] sm:$0x11 pattern:$0x75316420] }
 0x12e   :  { %v1194_v54 = vcombine.high %v1415_v53, %v1415_v53  ;;  %1197 = vst.msk [vmem:[#allocation4] sm:$0x1] %vm972_vm2, %v1415_v53 }
 0x130   :  { %1198 = vst.msk [vmem:[#allocation4 + $0x1] sm:$0x1] %vm972_vm2, %v1194_v54 }
 0x132   :  { %v1200_v43 = vld [vmem:[#allocation3 + $0x8] sm:$0xff] }
 0x133   :  { %1440 = vmatpush3.msra.mxu1 %v1200_v43 }
 0x134   :  { %1441 = vmatprep.subr.mxu1 %v1581_v0  ;;  %v1202_v46 = vld [vmem:[#allocation3 + $0x18] sm:$0xff] }
 0x135   :  { %1442 = vmatpush3.msra.mxu1 %v1199_v45  ;;  %v1416_v55 = vld [vmem:[#allocation4] ss:$0 sm:$0xff] }
 0x136   :  { %1444 = vmatmul.mubr.msk.f32.vlgmr.msra.gmra.mxu1 %vm1219_vm3, %v1203_v44  ;;  %1446 = vmatprep.subr.mxu1 %v1581_v0 }
 0x137   :  { %1447 = vmatpush3.msra.mxu1 %v1202_v46  ;;  %1450 = vmatprep.mubr.msk.f32.mxu1 %vm1582_vm1, %v1581_v0 }
 0x138   :  { %1448 = vmatprep.subr.mxu1 %v1581_v0  ;;  %v1417_v0 = vld [vmem:[#allocation4 + $0x1] ss:$0 sm:$0xff] }
 0x139   :  { %1449 = vmatpush3.msra.mxu1 %v1201_v48 }
 0x13a   :  { %1451 = vmatmul.mubr.msk.f32.vlgmr.msra.gmra.mxu1 %vm1219_vm3, %v1204_v47 }
 0x1f6   :  { %v1289_v56 = vpop.f32.mrf.mxu1 }
 0x1f7   :  { %v1290_v57 = vadd.f32 %v1416_v55, %v1289_v56 }
 0x1f8   :  { %v1445_v58 = vpop.f32.mrf.mxu1 }
 0x1f9   :  { %1367 = vst.msk [vmem:[#allocation13] sm:$0xff] %vm1366_vm4, %v1290_v57 }
 0x1fa   :  { %v1362_v59 = vpop.f32.mrf.mxu1 }
 0x1fb   :  { %v1363_v60 = vadd.f32 %v1417_v0, %v1362_v59 }
 0x1fc   :  { %v1452_v61 = vpop.f32.mrf.mxu1 }
 0x1fd   :  { %1368 = vst.msk [vmem:[#allocation13 + $0x8] sm:$0xff] %vm1366_vm4, %v1363_v60 }
 0x1fe   :  { %1556 = shalt.err (!%p1553_p10)
}
 0x1ff   :  { %1380 = dma.vmem_to_hbm [thread:$0]  %s1375_s3, 256, %s1731_s4, [#allocation7], %s1579_s0, %s1579_s0, %s1580_s9  }
 0x200   :  { %1571 = dma.done.wait [#allocation7], 256  }
 0x201   :  { %1572 = vsyncadd [#allocation7], 4294967040 }
 0x202   :  { %1384 = vsyncpa [#allocation6], 1 }
 0x203   :  { %1385 = vsyncpa [#allocation9], 1 }
 0x204   :  { %1386 = vsyncpa [#allocation12], 1 }
 0x205   :  { %1387 = vsyncpa [#allocation7], 1 }

</bundles_post_ra>
